<compile_context>
chip_gen: v7x
topology: tpu7x:2x2x1
jax: 0.10.0
libtpu: 0.0.40
codegen_flags: <defaults>
</compile_context>

<pallas_src>
import functools

import jax
import jax.numpy as jnp
from jax import lax
from jax.experimental import pallas as pl
from jax.experimental.pallas import tpu as pltpu

_LANE = 128


def _bigram_kernel(ids_ref, emb_ref, pos_ref, wqkv_ref, wfc_ref, bfc_ref, out_ref):
    """One grid step == one batch element. All operands lane-padded to 128."""
    T = ids_ref.shape[0]                 # sequence length for this batch element
    vocab = emb_ref.shape[0]
    EP = emb_ref.shape[1]                # lane-padded embedding width (128)

    # ---- fused token-embedding gather: one-hot(ids) @ table on the MXU ----
    ids = ids_ref[...]                                            # (T, 1) int32
    vocab_iota = lax.broadcasted_iota(jnp.int32, (T, vocab), 1)
    one_hot = (vocab_iota == ids).astype(jnp.float32)             # (T, vocab)
    tok = jnp.dot(one_hot, emb_ref[...],
                  preferred_element_type=jnp.float32)             # (T, EP)

    # positional embeddings: direct per-block add (no concat)
    x = tok + pos_ref[0:T, :]                                     # (T, EP)

    # ---- fused q/k/v projection: one matmul, tile-aligned slices ----
    # wq was pre-scaled by n_embed**-0.5 in prepare_params, so no scale here.
    qkv = jnp.dot(x, wqkv_ref[...],
                  preferred_element_type=jnp.float32)             # (T, 3*EP)
    q = qkv[:, :EP]
    k = qkv[:, EP:2 * EP]
    v = qkv[:, 2 * EP:]
    # padded lanes of q/k/v are exactly zero -> contribute nothing below.

    # scores (T, T): contract the lane dim directly (no explicit transpose)
    scores = lax.dot_general(
        q, k, dimension_numbers=(((1,), (1,)), ((), ())),
        preferred_element_type=jnp.float32)                       # (T, T)

    # causal (tril) mask
    row = lax.broadcasted_iota(jnp.int32, (T, T), 0)
    col = lax.broadcasted_iota(jnp.int32, (T, T), 1)
    scores = jnp.where(col <= row, scores, jnp.float32(-1e30))

    # softmax over keys (f32 on VPU/EUP; reciprocal goes to the EUP slot)
    m = jnp.max(scores, axis=-1, keepdims=True)
    p = jnp.exp(scores - m)
    denom = jnp.sum(p, axis=-1, keepdims=True)
    att = p * pl.reciprocal(denom, approx=True)                   # (T, T)

    attn_out = jnp.dot(att, v, preferred_element_type=jnp.float32)   # (T, EP)

    # final linear (lane-dense (T, VP) store, VP = 128)
    out_ref[...] = (jnp.dot(attn_out, wfc_ref[...],
                            preferred_element_type=jnp.float32)
                    + bfc_ref[...])


def prepare_params(params):
    """ONE-TIME parameter prep: lane-pad to 128, fuse q/k/v, pre-scale query.

    Called once outside the training/inference hot loop; `bigram_forward`
    consumes the returned dict directly with zero per-call weight glue.
    """
    emb = jnp.asarray(params["embedding"], jnp.float32)          # (vocab, E)
    pos = jnp.asarray(params["pos_embedding"], jnp.float32)      # (block_size, E)
    wq = jnp.asarray(params["wq"], jnp.float32)                  # (E, E)
    wk = jnp.asarray(params["wk"], jnp.float32)
    wv = jnp.asarray(params["wv"], jnp.float32)
    wfc = jnp.asarray(params["wfc"], jnp.float32)                # (E, V)
    bfc = jnp.asarray(params["bfc"], jnp.float32)                # (1, V)

    E = emb.shape[1]
    V = wfc.shape[1]
    EP = pl.cdiv(E, _LANE) * _LANE                               # 128
    VP = pl.cdiv(V, _LANE) * _LANE                               # 128

    def pad_to(w, rows, cols):
        return jnp.pad(w, ((0, rows - w.shape[0]), (0, cols - w.shape[1])))

    # fold the attention scale into the query projection once
    wq_scaled = wq * jnp.float32(E ** -0.5)

    prep = {
        "embedding": pad_to(emb, emb.shape[0], EP),              # (vocab, EP)
        "pos_embedding": pad_to(pos, pos.shape[0], EP),          # (block_size, EP)
        "w_qkv": jnp.concatenate(
            [pad_to(wq_scaled, EP, EP), pad_to(wk, EP, EP), pad_to(wv, EP, EP)],
            axis=1),                                             # (EP, 3*EP)
        "wfc": pad_to(wfc, EP, VP),                              # (EP, VP)
        "bfc": pad_to(bfc, 1, VP),                               # (1, VP)
    }
    return jax.tree_util.tree_map(jax.block_until_ready, prep)


@functools.partial(jax.jit, static_argnames=("vocab_size",))
def bigram_forward(index, prep, *, vocab_size):
    """Forward pass of BigramLanguageModelV4 (targets=None → loss=None)."""
    B, T = index.shape
    emb_p = prep["embedding"]
    pos_p = prep["pos_embedding"]
    w_qkv = prep["w_qkv"]
    wfc_p = prep["wfc"]
    bfc_p = prep["bfc"]

    vocab_rows, EP = emb_p.shape
    VP = wfc_p.shape[1]
    BT = B * T

    ids2d = index.reshape(BT, 1).astype(jnp.int32)               # only per-call glue

    out_p = pl.pallas_call(
        _bigram_kernel,
        out_shape=jax.ShapeDtypeStruct((BT, VP), jnp.float32),
        grid=(B,),
        in_specs=[
            pl.BlockSpec((T, 1), lambda b: (b, 0)),              # ids for batch b
            pl.BlockSpec((vocab_rows, EP), lambda b: (0, 0)),    # emb table (resident)
            pl.BlockSpec(pos_p.shape, lambda b: (0, 0)),         # pos emb (resident)
            pl.BlockSpec(w_qkv.shape, lambda b: (0, 0)),         # fused qkv weight
            pl.BlockSpec(wfc_p.shape, lambda b: (0, 0)),         # fc weight
            pl.BlockSpec(bfc_p.shape, lambda b: (0, 0)),         # fc bias
        ],
        out_specs=pl.BlockSpec((T, VP), lambda b: (b, 0)),
        compiler_params=pltpu.CompilerParams(
            dimension_semantics=("parallel",)),                  # megacore over B (v7x)
    )(ids2d, emb_p, pos_p, w_qkv, wfc_p, bfc_p)

    logits = out_p[:, :vocab_size].reshape(B, T, vocab_size)
    loss = None  # targets=None path; TODO(synk): cross-entropy loss path not exercised here
    return logits, loss


def _reference_forward(index, params):
    """Pure-JAX reference for verification (mirrors the PyTorch module)."""
    emb = params["embedding"]
    pos_emb = params["pos_embedding"]
    B, T = index.shape
    E = emb.shape[1]
    x = jnp.take(emb, index, axis=0) + pos_emb[:T][None]
    q = x @ params["wq"]
    k = x @ params["wk"]
    v = x @ params["wv"]
    scores = jnp.einsum("btd,bsd->bts", q, k) * (E ** -0.5)
    mask = jnp.tril(jnp.ones((T, T), dtype=bool))
    scores = jnp.where(mask[None], scores, -jnp.inf)
    att = jax.nn.softmax(scores, axis=-1)
    out = jnp.einsum("bts,bsd->btd", att, v)
    return out @ params["wfc"] + params["bfc"][0]


if __name__ == "__main__":
    vocab_size = 64
    block_size = 8
    n_embed = 32
    B, T = 2, block_size

    key = jax.random.PRNGKey(0)
    ks = jax.random.split(key, 8)

    params = {
        "embedding":     jax.random.normal(ks[0], (vocab_size, n_embed), jnp.float32) * 0.02,
        "pos_embedding": jax.random.normal(ks[1], (block_size, n_embed), jnp.float32) * 0.02,
        # Linear weights stored already-transposed so activations use x @ W.
        "wq":  jax.random.normal(ks[2], (n_embed, n_embed), jnp.float32) * 0.1,
        "wk":  jax.random.normal(ks[3], (n_embed, n_embed), jnp.float32) * 0.1,
        "wv":  jax.random.normal(ks[4], (n_embed, n_embed), jnp.float32) * 0.1,
        "wfc": jax.random.normal(ks[5], (n_embed, vocab_size), jnp.float32) * 0.1,
        "bfc": jax.random.normal(ks[6], (1, vocab_size), jnp.float32) * 0.1,
    }

    index = jax.random.randint(ks[7], (B, T), 0, vocab_size, dtype=jnp.int32)

    prep = prepare_params(params)                     # one-time, outside the hot path

    logits, loss = bigram_forward(index, prep, vocab_size=vocab_size)
    logits = jax.block_until_ready(logits)

    ref = _reference_forward(index, params)
    assert logits.shape == (B, T, vocab_size)
    assert loss is None
    assert jnp.allclose(logits, ref, atol=1e-3, rtol=1e-3), "mismatch vs reference"

    print("KERNEL_OK")
</pallas_src>

<mosaic_0001>
module attributes {stable_mosaic.version = 11 : i64} {
  func.func @_bigram_kernel(%arg0: i32, %arg1: memref<8x1xi32, #tpu.memory_space<vmem>>, %arg2: memref<64x128xf32, #tpu.memory_space<vmem>>, %arg3: memref<8x128xf32, #tpu.memory_space<vmem>>, %arg4: memref<128x384xf32, #tpu.memory_space<vmem>>, %arg5: memref<128x128xf32, #tpu.memory_space<vmem>>, %arg6: memref<1x128xf32, #tpu.memory_space<vmem>>, %arg7: memref<8x128xf32, #tpu.memory_space<vmem>>) attributes {dimension_semantics = [#tpu.dimension_semantics<parallel>], iteration_bounds = array<i64: 2>, scalar_prefetch = 0 : i64, scratch_operands = 0 : i64, tpu.core_type = #tpu.core_type<tc>, window_params = [{transform_indices = @transform_0, window_bounds = array<i64: 8, 1>}, {pipeline_mode = #tpu.pipeline_mode<synchronous>, transform_indices = @transform_1, window_bounds = array<i64: 64, 128>}, {pipeline_mode = #tpu.pipeline_mode<synchronous>, transform_indices = @transform_2, window_bounds = array<i64: 8, 128>}, {pipeline_mode = #tpu.pipeline_mode<synchronous>, transform_indices = @transform_3, window_bounds = array<i64: 128, 384>}, {pipeline_mode = #tpu.pipeline_mode<synchronous>, transform_indices = @transform_4, window_bounds = array<i64: 128, 128>}, {pipeline_mode = #tpu.pipeline_mode<synchronous>, transform_indices = @transform_5, window_bounds = array<i64: 1, 128>}, {transform_indices = @transform_6, window_bounds = array<i64: 8, 128>}]} {
    %c0 = arith.constant 0 : index
    %c0_0 = arith.constant 0 : index
    %0 = vector.load %arg1[%c0, %c0_0] : memref<8x1xi32, #tpu.memory_space<vmem>>, vector<8x1xi32>
    %1 = tpu.iota {dimensions = array<i32: 1>} : vector<8x64xi32>
    %2 = vector.broadcast %0 : vector<8x1xi32> to vector<8x64xi32>
    %3 = arith.cmpi eq, %1, %2 : vector<8x64xi32>
    %4 = arith.extui %3 : vector<8x64xi1> to vector<8x64xi32>
    %5 = arith.sitofp %4 : vector<8x64xi32> to vector<8x64xf32>
    %c0_1 = arith.constant 0 : index
    %c0_2 = arith.constant 0 : index
    %6 = vector.load %arg2[%c0_1, %c0_2] : memref<64x128xf32, #tpu.memory_space<vmem>>, vector<64x128xf32>
    %cst = arith.constant dense<0.000000e+00> : vector<8x128xf32>
    %7 = tpu.matmul %5, %6, %cst {dimension_numbers = #tpu.dot_dimension_numbers<[1], [0], [0], [1], [0, 0, 1, 1], [], []>} : vector<8x64xf32>, vector<64x128xf32>, vector<8x128xf32> -> vector<8x128xf32>
    %c0_3 = arith.constant 0 : index
    %c0_4 = arith.constant 0 : index
    %8 = vector.load %arg3[%c0_3, %c0_4] : memref<8x128xf32, #tpu.memory_space<vmem>>, vector<8x128xf32>
    %9 = arith.addf %7, %8 : vector<8x128xf32>
    %c0_5 = arith.constant 0 : index
    %c0_6 = arith.constant 0 : index
    %10 = vector.load %arg4[%c0_5, %c0_6] : memref<128x384xf32, #tpu.memory_space<vmem>>, vector<128x384xf32>
    %cst_7 = arith.constant dense<0.000000e+00> : vector<8x384xf32>
    %11 = tpu.matmul %9, %10, %cst_7 {dimension_numbers = #tpu.dot_dimension_numbers<[1], [0], [0], [1], [0, 0, 1, 1], [], []>} : vector<8x128xf32>, vector<128x384xf32>, vector<8x384xf32> -> vector<8x384xf32>
    %12 = vector.extract_strided_slice %11 {offsets = [0, 0], sizes = [8, 128], strides = [1, 1]} : vector<8x384xf32> to vector<8x128xf32>
    %13 = vector.extract_strided_slice %11 {offsets = [0, 128], sizes = [8, 128], strides = [1, 1]} : vector<8x384xf32> to vector<8x128xf32>
    %14 = vector.extract_strided_slice %11 {offsets = [0, 256], sizes = [8, 128], strides = [1, 1]} : vector<8x384xf32> to vector<8x128xf32>
    %cst_8 = arith.constant dense<0.000000e+00> : vector<8x8xf32>
    %15 = tpu.matmul %12, %13, %cst_8 {dimension_numbers = #tpu.dot_dimension_numbers<[1], [1], [0], [0], [0, 0, 1, 0], [], []>} : vector<8x128xf32>, vector<8x128xf32>, vector<8x8xf32> -> vector<8x8xf32>
    %16 = tpu.iota {dimensions = array<i32: 0>} : vector<8x8xi32>
    %17 = tpu.iota {dimensions = array<i32: 1>} : vector<8x8xi32>
    %18 = arith.cmpi sle, %17, %16 : vector<8x8xi32>
    %cst_9 = arith.constant -1.000000e+30 : f32
    %19 = vector.broadcast %cst_9 : f32 to vector<8x8xf32>
    %20 = arith.select %18, %15, %19 : vector<8x8xi1>, vector<8x8xf32>
    %cst_10 = arith.constant dense<0xFF800000> : vector<8xf32>
    %21 = vector.multi_reduction <maximumf>, %20, %cst_10 [1] : vector<8x8xf32> to vector<8xf32>
    %22 = vector.shape_cast %21 : vector<8xf32> to vector<8x1xf32>
    %23 = vector.broadcast %22 : vector<8x1xf32> to vector<8x8xf32>
    %24 = arith.subf %20, %23 : vector<8x8xf32>
    %25 = math.exp %24 : vector<8x8xf32>
    %cst_11 = arith.constant dense<0.000000e+00> : vector<8xf32>
    %26 = vector.multi_reduction <add>, %25, %cst_11 [1] : vector<8x8xf32> to vector<8xf32>
    %27 = vector.shape_cast %26 : vector<8xf32> to vector<8x1xf32>
    %28 = tpu.reciprocal %27 {approx = true} : vector<8x1xf32> -> vector<8x1xf32>
    %29 = vector.broadcast %28 : vector<8x1xf32> to vector<8x8xf32>
    %30 = arith.mulf %25, %29 : vector<8x8xf32>
    %cst_12 = arith.constant dense<0.000000e+00> : vector<8x128xf32>
    %31 = tpu.matmul %30, %14, %cst_12 {dimension_numbers = #tpu.dot_dimension_numbers<[1], [0], [0], [1], [0, 0, 1, 1], [], []>} : vector<8x8xf32>, vector<8x128xf32>, vector<8x128xf32> -> vector<8x128xf32>
    %c0_13 = arith.constant 0 : index
    %c0_14 = arith.constant 0 : index
    %32 = vector.load %arg5[%c0_13, %c0_14] : memref<128x128xf32, #tpu.memory_space<vmem>>, vector<128x128xf32>
    %cst_15 = arith.constant dense<0.000000e+00> : vector<8x128xf32>
    %33 = tpu.matmul %31, %32, %cst_15 {dimension_numbers = #tpu.dot_dimension_numbers<[1], [0], [0], [1], [0, 0, 1, 1], [], []>} : vector<8x128xf32>, vector<128x128xf32>, vector<8x128xf32> -> vector<8x128xf32>
    %c0_16 = arith.constant 0 : index
    %c0_17 = arith.constant 0 : index
    %34 = vector.load %arg6[%c0_16, %c0_17] : memref<1x128xf32, #tpu.memory_space<vmem>>, vector<1x128xf32>
    %35 = vector.broadcast %34 : vector<1x128xf32> to vector<8x128xf32>
    %36 = arith.addf %33, %35 : vector<8x128xf32>
    %c0_18 = arith.constant 0 : index
    %c0_19 = arith.constant 0 : index
    %37 = vector.load %arg7[%c0_18, %c0_19] : memref<8x128xf32, #tpu.memory_space<vmem>>, vector<8x128xf32>
    tpu.vector_store %arg7[%c0_18, %c0_19], %36 {strides = array<i32>} : memref<8x128xf32, #tpu.memory_space<vmem>>, vector<8x128xf32>,
    return
  }
  func.func @transform_0(%arg0: i32) -> (i32, i32) {
    %c0_i32 = arith.constant 0 : i32
    %c0_i32_0 = arith.constant 0 : i32
    return %arg0, %c0_i32 : i32, i32
  }
  func.func @transform_1(%arg0: i32) -> (i32, i32) {
    %c0_i32 = arith.constant 0 : i32
    %c0_i32_0 = arith.constant 0 : i32
    %c0_i32_1 = arith.constant 0 : i32
    return %c0_i32, %c0_i32_0 : i32, i32
  }
  func.func @transform_2(%arg0: i32) -> (i32, i32) {
    %c0_i32 = arith.constant 0 : i32
    %c0_i32_0 = arith.constant 0 : i32
    %c0_i32_1 = arith.constant 0 : i32
    return %c0_i32, %c0_i32_0 : i32, i32
  }
  func.func @transform_3(%arg0: i32) -> (i32, i32) {
    %c0_i32 = arith.constant 0 : i32
    %c0_i32_0 = arith.constant 0 : i32
    %c0_i32_1 = arith.constant 0 : i32
    return %c0_i32, %c0_i32_0 : i32, i32
  }
  func.func @transform_4(%arg0: i32) -> (i32, i32) {
    %c0_i32 = arith.constant 0 : i32
    %c0_i32_0 = arith.constant 0 : i32
    %c0_i32_1 = arith.constant 0 : i32
    return %c0_i32, %c0_i32_0 : i32, i32
  }
  func.func @transform_5(%arg0: i32) -> (i32, i32) {
    %c0_i32 = arith.constant 0 : i32
    %c0_i32_0 = arith.constant 0 : i32
    %c0_i32_1 = arith.constant 0 : i32
    return %c0_i32, %c0_i32_0 : i32, i32
  }
  func.func @transform_6(%arg0: i32) -> (i32, i32) {
    %c0_i32 = arith.constant 0 : i32
    %c0_i32_0 = arith.constant 0 : i32
    return %arg0, %c0_i32 : i32, i32
  }
}

</mosaic_0001>

<bundles_post_ra>
// kernel: bigram_forward.1
= control target key start
LH: loop header
LB: loop body
LE: loop exit
PB: predicated region body
PF: predicated region fallthrough
CT: control target
= control target key end

     0   :  { %11 = vsyncpa [#allocation3], 0  ;;  %s1541_s0 = inlined_call_operand.vmem [shape: s32[16,1], index: 0, kind: input, shape index: {}]   ;;  %s1542_s1 = inlined_call_operand.hbm [shape: f32[64,128], index: 1, kind: input, shape index: {}]   ;;  %s1543_s2 = inlined_call_operand.vmem [shape: f32[8,128], index: 2, kind: input, shape index: {}]   ;;  %s1544_s3 = inlined_call_operand.hbm [shape: f32[128,384], index: 3, kind: input, shape index: {}]   ;;  %s1545_s4 = inlined_call_operand.hbm [shape: f32[128,128], index: 4, kind: input, shape index: {}]   ;;  %s1546_s5 = inlined_call_operand.vmem [shape: f32[1,128], index: 5, kind: input, shape index: {}]   ;;  %s1547_s6 = inlined_call_operand.vmem [shape: f32[16,128], index: 6, kind: output, shape index: {}]  }
   0x1   :  { %12 = vsyncpa [#allocation5], 0  ;;  %s1364_s21 = smov 0  }
   0x2 LB: > { %s1318_s22 = smov [#allocation4]   ;;  %s1370_s24 = sadd.s32 4294967295, %s1316_s21   ;;  %s1316_s21 = sphi %s1364_s21, %s18_s21  }
   0x3   : > { %s208_s23 = sshll.u32 %s1318_s22, 4  ;;  %p911_p0 = scmp.ge.s32.totalorder %s1316_s21, 1  ;;  %s1379_s23 = int_to_ptr.vmem [resolvable:$true] %s208_s23 }
   0x4   : > { %p180_p1 = scmp.lt.s32.totalorder %s1316_s21, 3  ;;  %p1548_p2 = scmp.eq.s32.totalorder %s1370_s24, 0 }
   0x5   : > { %s1319_s26 = smov [#allocation2]   ;;  %s1320_s29 = smov [#allocation6]  }
   0x6   : > { %p1375_p3 = pnand %p911_p0, %p180_p1  ;;  %s192_s27 = sshll.u32 %s1319_s26, 4  ;;  %s1383_s27 = int_to_ptr.vmem [resolvable:$true] %s192_s27 }
   0x7   : > { %s1391_s30 = sshll.u32 %s1320_s29, 4  ;;  %s1218_s9 = scalar_lea.hbm %s1544_s3, 6144  ;;  %s222_s30 = int_to_ptr.vmem [resolvable:$true] %s1391_s30 }
   0x8   : > { %s1550_s25 = scalar_select %p1375_p3, 1, 0 }
   0x9   : > { %p1178_p4 = pneg %p1375_p3  ;;  %p1219_p6 = scmp.ne.s32.totalorder %s1544_s3, %s1218_s9 }
   0xa   : > { %p1225_p10 = scmp.lt.u32.totalorder %s1218_s9, %s1544_s3 }
   0xb   : > { %p1387_p5 = pnand %p1548_p2, %p1178_p4 }
   0xd   : > { %p1401_p7 = pneg %p1387_p5 }
   0xf   : > { %p1221_p8 = pnand %p1401_p7, %p1219_p6 }
  0x11   : > { %p1222_p9 = pneg %p1221_p8 }
  0x13   : > { %p1227_p11 = pnand %p1225_p10, %p1222_p9 }
  0x15   : > { %1230 = shalt.err (!%p1227_p11)
}
  0x16   : > { %s1231_s15 = scalar_lea.vmem %s1379_s23, 6144  ;;  %p1239_p1 = scmp.lt.s32.totalorder %s1379_s23, %s1379_s23 }
  0x17   : > { %p1232_p12 = scmp.ne.s32.totalorder %s1379_s23, %s1231_s15  ;;  %p1240_p4 = scmp.lt.s32.totalorder %s1231_s15, %s1231_s15 }
  0x19   : > { %p1234_p13 = pnand %p1232_p12, %p1401_p7  ;;  %p1241_p6 = por %p1240_p4, %p1239_p1 }
  0x1b   : > { %p1235_p0 = pneg %p1234_p13 }
  0x1d   : > { %p1242_p8 = pnand %p1241_p6, %p1235_p0 }
  0x1f   : > { %1245 = shalt.err (!%p1242_p8)
}
  0x20   : > { %s1321_s16 = smov 384   ;;  %s1322_s17 = smov 24  }
  0x21   : > { %1184 = dma.hbm_to_vmem [thread:$0]  (!%p1387_p5), %s1544_s3, 6144, %s1379_s23, [#allocation5], %s1321_s16, %s1321_s16, %s1322_s17  }
  0x22   : > { %s1246_s26 = scalar_lea.hbm %s1542_s1, 1024 }
  0x23   : > { %p1247_p9 = scmp.ne.s32.totalorder %s1542_s1, %s1246_s26  ;;  %p1253_p12 = scmp.lt.u32.totalorder %s1246_s26, %s1542_s1 }
  0x25   : > { %p1249_p10 = pnand %p1247_p9, %p1401_p7 }
  0x27   : > { %p1250_p11 = pneg %p1249_p10 }
  0x29   : > { %p1255_p13 = pnand %p1253_p12, %p1250_p11 }
  0x2b   : > { %1258 = shalt.err (!%p1255_p13)
}
  0x2c   : > { %s1259_s23 = scalar_lea.vmem %s1383_s27, 1024  ;;  %p1267_p6 = scmp.lt.s32.totalorder %s1383_s27, %s1383_s27 }
  0x2d   : > { %p1260_p0 = scmp.ne.s32.totalorder %s1383_s27, %s1259_s23  ;;  %p1268_p8 = scmp.lt.s32.totalorder %s1259_s23, %s1259_s23 }
  0x2f   : > { %p1262_p1 = pnand %p1260_p0, %p1401_p7  ;;  %p1269_p9 = por %p1268_p8, %p1267_p6 }
  0x31   : > { %p1263_p4 = pneg %p1262_p1 }
  0x33   : > { %p1270_p10 = pnand %p1269_p9, %p1263_p4 }
  0x35   : > { %1273 = shalt.err (!%p1270_p10)
}
  0x36   : > { %s1323_s10 = smov 128   ;;  %s1324_s11 = smov 8  }
  0x37   : > { %1181 = dma.hbm_to_vmem [thread:$0]  (!%p1387_p5), %s1542_s1, 1024, %s1383_s27, [#allocation3], %s1323_s10, %s1323_s10, %s1324_s11  }
  0x38   : > { %s1274_s17 = scalar_lea.hbm %s1545_s4, 2048 }
  0x39   : > { %p1275_p11 = scmp.ne.s32.totalorder %s1545_s4, %s1274_s17  ;;  %p1281_p0 = scmp.lt.u32.totalorder %s1274_s17, %s1545_s4 }
  0x3b   : > { %p1277_p12 = pnand %p1275_p11, %p1401_p7 }
  0x3d   : > { %p1278_p13 = pneg %p1277_p12 }
  0x3f   : > { %p1283_p1 = pnand %p1281_p0, %p1278_p13 }
  0x41   : > { %1286 = shalt.err (!%p1283_p1)
}
  0x42   : > { %s1287_s26 = scalar_lea.vmem %s222_s30, 2048  ;;  %p1295_p9 = scmp.lt.s32.totalorder %s222_s30, %s222_s30 }
  0x43   : > { %p1288_p4 = scmp.ne.s32.totalorder %s222_s30, %s1287_s26  ;;  %p1296_p10 = scmp.lt.s32.totalorder %s1287_s26, %s1287_s26 }
  0x45   : > { %p1290_p6 = pnand %p1288_p4, %p1401_p7  ;;  %p1297_p2 = por %p1296_p10, %p1295_p9 }
  0x47   : > { %p1291_p8 = pneg %p1290_p6 }
  0x49   : > { %p1298_p3 = pnand %p1297_p2, %p1291_p8 }
  0x4b   : > { %1301 = shalt.err (!%p1298_p3)
}
  0x4c   : > { %1187 = dma.hbm_to_vmem [thread:$0]  (!%p1387_p5), %s1545_s4, 2048, %s222_s30, [#allocation5], %s1323_s10, %s1323_s10, %s1324_s11  }
  0x4d   : > { %p1553_p11 = scmp.ne.s32.totalorder %s1550_s25, 0 }
  0x4e   : > { %p1554_p12 = scmp.eq.s32.totalorder (!%p1553_p11), %s1370_s24, 0 }
  0x4f   : > { %247 = sbr.rel (%p1553_p11) target bundleno = 1611 (0x64b), region = 44 }
  0x56   : > { %1307 = dma.done.wait (%p1554_p12), [#allocation3], 1024   ;;  %p1555_p7 = pmov %p1554_p12 }
  0x58   : > { %1309 = vsyncadd (%p1555_p7), [#allocation3], 4294966272  ;;  %p1556_p13 = pmov %p1555_p7 }
  0x59   : > { %p1557_p2 = pmov %p1555_p7 }
  0x5a   : > { %1311 = dma.done.wait (%p1556_p13), [#allocation5], 8192  }
  0x5b   : > { %1313 = vsyncadd (%p1557_p2), [#allocation5], 4294959104  ;;  %p283_p3 = scmp.lt.s32.totalorder %s1370_s24, 1  ;;  %v1325_v0 = vmov 0   ;;  %v1326_v1 = vmov 0.0|0.0   ;;  %v1327_v2 = vmov 0.0   ;;  %v292_v61 = vlaneseq }
  0x5c   : > { %1213 = vset.pattern.permute.xlu0 %v1325_v0  ;;  %1074 = vmatprep.subr.bf16.mxu0 %v1326_v1  ;;  %v300_v4 = vld [vmem:[#allocation2] sm:$0xff]  ;;  %v301_v5 = vld [vmem:[#allocation2 + $0x8] sm:$0xff]  ;;  %v302_v7 = vld [vmem:[#allocation2 + $0x10] sm:$0xff]  ;;  %vm1328_vm0 = vmmov 0   ;;  %vm309_vm1 = vcmask 523264   ;;  %vm646_vm4 = vcmask 64512  }
  0x5d   : > { %s1559_s24 = smov (!%p283_p3, %s1370_s24), 1  ;;  %495 = vmatprep.mubr.f32.mxu1 %v1327_v2  ;;  %v1075_v6 = vpack.c.bf16 %v301_v5, %v300_v4  ;;  %v303_v8 = vld [vmem:[#allocation2 + $0x18] sm:$0xff]  ;;  %991 = vmatprep.mubr.msk.f32.mxu0 %vm1328_vm0, %v1327_v2  ;;  %v384_v10 = vld [vmem:[#allocation4 + $0x8] sm:$0xff]  ;;  %v387_v11 = vld [vmem:[#allocation4 + $0x20] sm:$0xff]  ;;  %v1493_v62 = vand.u32 127, %v292_v61 }
  0x5e   : > { %s920_s25 = sshll.u32 %s1559_s24, 3  ;;  %v1078_v9 = vpack.c.bf16 %v303_v8, %v302_v7  ;;  %v383_v12 = vld [vmem:[#allocation4] sm:$0xff]  ;;  %v305_v14 = vld [vmem:[#allocation2 + $0x28] sm:$0xff]  ;;  %v1086_v15 = vpack.c.bf16 %v387_v11, %v384_v10  ;;  %v386_v16 = vld [vmem:[#allocation4 + $0x18] sm:$0xff] }
  0x5f   : > { %s286_s12 = scalar_lea.vmem %s1541_s0, %s920_s25  ;;  %1076 = vmatpush3.bf16.msra.mxu0 %v1075_v6  ;;  %v304_v13 = vld [vmem:[#allocation2 + $0x20] sm:$0xff]  ;;  %v1088_v17 = vpack.c.bf16 %v386_v16, %v383_v12  ;;  %v390_v18 = vld [vmem:[#allocation4 + $0x38] sm:$0xff]  ;;  %v393_v19 = vld [vmem:[#allocation4 + $0x50] sm:$0xff]  ;;  %s290_s13 = scalar_lea.vmem %s1547_s6, %s920_s25 }
  0x60   : > { %v291_v3 = vld [vmem:[%s286_s12] sm:$0xff]  ;;  %1077 = vmatprep.subr.bf16.mxu0 %v1326_v1  ;;  %v389_v20 = vld [vmem:[#allocation4 + $0x30] sm:$0xff]  ;;  %1087 = vmatprep.subr.bf16.mxu1 %v1086_v15  ;;  %v1090_v21 = vpack.c.bf16 %v393_v19, %v390_v18  ;;  %v392_v22 = vld [vmem:[#allocation4 + $0x48] sm:$0xff]  ;;  %v1081_v23 = vpack.c.bf16 %v305_v14, %v304_v13 }
  0x61   : > { %295 = vperm.xlu0 %1213, %v291_v3   ;;  %v306_v24 = vld [vmem:[#allocation2 + $0x30] sm:$0xff]  ;;  %1089 = vmatpush1.bf16.msra.mxu1 %v1088_v17  ;;  %v1092_v25 = vpack.c.bf16 %v392_v22, %v389_v20  ;;  %v307_v26 = vld [vmem:[#allocation2 + $0x38] sm:$0xff]  ;;  %v396_v27 = vld [vmem:[#allocation4 + $0x68] sm:$0xff] }
  0x62   : > { %1091 = vmatprep.subr.bf16.mxu1 %v1090_v21  ;;  %v399_v28 = vld [vmem:[#allocation4 + $0x80] sm:$0xff]  ;;  %v398_v31 = vld [vmem:[#allocation4 + $0x78] sm:$0xff]  ;;  %v1084_v32 = vpack.c.bf16 %v307_v26, %v306_v24  ;;  %v405_v35 = vld [vmem:[#allocation4 + $0xb0] sm:$0xff] }
  0x63   : > { %1079 = vmatpush3.bf16.msra.mxu0 %v1078_v9  ;;  %v1094_v29 = vpack.c.bf16 %v399_v28, %v396_v27  ;;  %v395_v30 = vld [vmem:[#allocation4 + $0x60] sm:$0xff]  ;;  %v402_v34 = vld [vmem:[#allocation4 + $0x98] sm:$0xff]  ;;  %v401_v37 = vld [vmem:[#allocation4 + $0x90] sm:$0xff] }
  0x64   : > { %1080 = vmatprep.subr.bf16.mxu0 %v1326_v1  ;;  %v1096_v33 = vpack.c.bf16 %v398_v31, %v395_v30  ;;  %v1098_v36 = vpack.c.bf16 %v405_v35, %v402_v34  ;;  %v404_v38 = vld [vmem:[#allocation4 + $0xa8] sm:$0xff]  ;;  %v411_v41 = vld [vmem:[#allocation4 + $0xe0] sm:$0xff]  ;;  %v410_v44 = vld [vmem:[#allocation4 + $0xd8] sm:$0xff] }
  0x65   : > { %1093 = vmatpush1.bf16.msra.mxu1 %v1092_v25  ;;  %v1100_v39 = vpack.c.bf16 %v404_v38, %v401_v37  ;;  %v408_v40 = vld [vmem:[#allocation4 + $0xc8] sm:$0xff]  ;;  %v407_v43 = vld [vmem:[#allocation4 + $0xc0] sm:$0xff]  ;;  %v414_v46 = vld [vmem:[#allocation4 + $0xf8] sm:$0xff]  ;;  %v643_v38 = vshrl.u32 %v292_v61, 7 }
  0x66   : > { %1095 = vmatprep.subr.bf16.mxu1 %v1094_v29  ;;  %v1102_v42 = vpack.c.bf16 %v411_v41, %v408_v40  ;;  %v1104_v45 = vpack.c.bf16 %v410_v44, %v407_v43  ;;  %v417_v47 = vld [vmem:[#allocation4 + $0x110] sm:$0xff]  ;;  %v416_v50 = vld [vmem:[#allocation4 + $0x108] sm:$0xff]  ;;  %v423_v53 = vld [vmem:[#allocation4 + $0x140] sm:$0xff] }
  0x67   : > { %1082 = vmatpush3.bf16.msra.mxu0 %v1081_v23  ;;  %v1106_v48 = vpack.c.bf16 %v417_v47, %v414_v46  ;;  %v413_v49 = vld [vmem:[#allocation4 + $0xf0] sm:$0xff]  ;;  %v420_v52 = vld [vmem:[#allocation4 + $0x128] sm:$0xff]  ;;  %v419_v55 = vld [vmem:[#allocation4 + $0x120] sm:$0xff]  ;;  %vm644_vm3 = vcmp.le.s32.totalorder %v1493_v62, %v643_v38 }
  0x68   : > { %1083 = vmatprep.subr.bf16.mxu0 %v1326_v1  ;;  %v1108_v51 = vpack.c.bf16 %v416_v50, %v413_v49  ;;  %v1110_v54 = vpack.c.bf16 %v423_v53, %v420_v52  ;;  %v422_v56 = vld [vmem:[#allocation4 + $0x138] sm:$0xff]  ;;  %v429_v59 = vld [vmem:[#allocation4 + $0x170] sm:$0xff]  ;;  %v388_v0 = vld [vmem:[#allocation4 + $0x28] sm:$0xff] }
  0x69   : > { %1097 = vmatpush1.bf16.msra.mxu1 %v1096_v33  ;;  %v1112_v57 = vpack.c.bf16 %v422_v56, %v419_v55  ;;  %v426_v58 = vld [vmem:[#allocation4 + $0x158] sm:$0xff]  ;;  %v385_v63 = vld [vmem:[#allocation4 + $0x10] sm:$0xff]  ;;  %v391_v5 = vld [vmem:[#allocation4 + $0x40] sm:$0xff] }
  0x6a   : > { %1099 = vmatprep.subr.bf16.mxu1 %v1098_v36  ;;  %v1114_v60 = vpack.c.bf16 %v429_v59, %v426_v58  ;;  %v1119_v4 = vpack.c.bf16 %v388_v0, %v385_v63  ;;  %v394_v6 = vld [vmem:[#allocation4 + $0x58] sm:$0xff]  ;;  %v397_v9 = vld [vmem:[#allocation4 + $0x70] sm:$0xff]  ;;  %v400_v10 = vld [vmem:[#allocation4 + $0x88] sm:$0xff] }
  0x6b   : > { %1085 = vmatpush3.bf16.msra.mxu0 %v1084_v32  ;;  %v1122_v8 = vpack.c.bf16 %v394_v6, %v391_v5  ;;  %v1125_v11 = vpack.c.bf16 %v400_v10, %v397_v9  ;;  %v403_v12 = vld [vmem:[#allocation4 + $0xa0] sm:$0xff]  ;;  %v406_v13 = vld [vmem:[#allocation4 + $0xb8] sm:$0xff]  ;;  %v409_v15 = vld [vmem:[#allocation4 + $0xd0] sm:$0xff] }
  0x6c   : > { %1118 = vmatprep.subr.bf16.mxu0 %v1326_v1  ;;  %v1128_v14 = vpack.c.bf16 %v406_v13, %v403_v12  ;;  %v412_v16 = vld [vmem:[#allocation4 + $0xe8] sm:$0xff]  ;;  %v415_v18 = vld [vmem:[#allocation4 + $0x100] sm:$0xff]  ;;  %v418_v19 = vld [vmem:[#allocation4 + $0x118] sm:$0xff] }
  0x6d   : > { %1101 = vmatpush1.bf16.msra.mxu1 %v1100_v39  ;;  %v1131_v17 = vpack.c.bf16 %v412_v16, %v409_v15  ;;  %v1134_v20 = vpack.c.bf16 %v418_v19, %v415_v18  ;;  %v421_v21 = vld [vmem:[#allocation4 + $0x130] sm:$0xff]  ;;  %v424_v22 = vld [vmem:[#allocation4 + $0x148] sm:$0xff]  ;;  %v427_v26 = vld [vmem:[#allocation4 + $0x160] sm:$0xff] }
  0x6e   : > { %1103 = vmatprep.subr.bf16.mxu1 %v1102_v42  ;;  %v1137_v23 = vpack.c.bf16 %v424_v22, %v421_v21  ;;  %v425_v24 = vld [vmem:[#allocation4 + $0x150] sm:$0xff]  ;;  %v428_v25 = vld [vmem:[#allocation4 + $0x168] sm:$0xff]  ;;  %v430_v28 = vld [vmem:[#allocation4 + $0x178] sm:$0xff] }
  0x6f   : > { %v1116_v27 = vpack.c.bf16 %v428_v25, %v425_v24  ;;  %v1140_v29 = vpack.c.bf16 %v430_v28, %v427_v26  ;;  %v308_v30 = vld [vmem:[%s1543_s2] sm:$0xff]  ;;  %v733_v49 = vld [vmem:[#allocation6 + $0x10] sm:$0xff]  ;;  %v742_v63 = vld [vmem:[#allocation6 + $0x58] sm:$0xff] }
  0x70   : > { %v735_v53 = vld [vmem:[#allocation6 + $0x20] sm:$0xff]  ;;  %v737_v56 = vld [vmem:[#allocation6 + $0x30] sm:$0xff] }
  0x71   : > { %1105 = vmatpush1.bf16.msra.mxu1 %v1104_v45  ;;  %v739_v59 = vld [vmem:[#allocation6 + $0x40] sm:$0xff]  ;;  %v745_v6 = vld [vmem:[#allocation6 + $0x70] sm:$0xff] }
  0x72   : > { %1107 = vmatprep.subr.bf16.mxu1 %v1106_v48  ;;  %v732_v48 = vld [vmem:[#allocation6 + $0x8] sm:$0xff] }
  0x75   : > { %1109 = vmatpush1.bf16.msra.mxu1 %v1108_v51  ;;  %v734_v51 = vld [vmem:[#allocation6 + $0x18] sm:$0xff] }
  0x76   : > { %1111 = vmatprep.subr.bf16.mxu1 %v1110_v54  ;;  %v1146_v52 = vpack.c.bf16 %v734_v51, %v733_v49  ;;  %v736_v54 = vld [vmem:[#allocation6 + $0x28] sm:$0xff] }
  0x77   : > { %v1149_v55 = vpack.c.bf16 %v736_v54, %v735_v53 }
  0x79   : > { %1113 = vmatpush1.bf16.msra.mxu1 %v1112_v57  ;;  %v738_v57 = vld [vmem:[#allocation6 + $0x38] sm:$0xff] }
  0x7a   : > { %1115 = vmatprep.subr.bf16.mxu1 %v1114_v60  ;;  %v1152_v58 = vpack.c.bf16 %v738_v57, %v737_v56  ;;  %v740_v60 = vld [vmem:[#allocation6 + $0x48] sm:$0xff] }
  0x7b   : > { %v1155_v61 = vpack.c.bf16 %v740_v60, %v739_v59 }
  0x7d   : > { %1117 = vmatpush1.bf16.msra.mxu1 %v1116_v27 }
  0x7e   : > { %1142 = vmatprep.subr.bf16.mxu1 %v1326_v1 }
  0xe0   : > { %v296_v3 = vpop.permute.xlu0 %295 }
  0xe1   : > { %vm297_vm2 = vcmp.eq.s32.totalorder %v1493_v62, %v296_v3  ;;  %v741_v62 = vld [vmem:[#allocation6 + $0x50] sm:$0xff]  ;;  %v743_v3 = vld [vmem:[#allocation6 + $0x60] sm:$0xff] }
  0xe2   : > { %v922_v7 = vsel %vm297_vm2, 1.0, %v1327_v2  ;;  %v1158_v0 = vpack.c.bf16 %v742_v63, %v741_v62 }
  0xe3   : > { %992 = vmatmul.mubr.msk.f32.vlgmr.msra.gmra.mrb[0].mxu0 %vm309_vm1, %v922_v7  ;;  %v746_v7 = vld [vmem:[#allocation6 + $0x78] sm:$0xff] }
  0xe4   : > { %1120 = vmatpush3.bf16.msra.mxu0 %v1119_v4  ;;  %1026 = vmatprep.mubr.msk.f32.mxu0 %vm1328_vm0, %v1327_v2  ;;  %v744_v4 = vld [vmem:[#allocation6 + $0x68] sm:$0xff] }
  0xe5   : > { %1121 = vmatprep.subr.bf16.mxu0 %v1326_v1  ;;  %v1161_v5 = vpack.c.bf16 %v744_v4, %v743_v3 }
  0xe8   : > { %1123 = vmatpush3.bf16.msra.mxu0 %v1122_v8  ;;  %v1164_v8 = vpack.c.bf16 %v746_v7, %v745_v6 }
  0xe9   : > { %1124 = vmatprep.subr.bf16.mxu0 %v1326_v1 }
  0xec   : > { %1126 = vmatpush3.bf16.msra.mxu0 %v1125_v11 }
  0xed   : > { %1127 = vmatprep.subr.bf16.mxu0 %v1326_v1 }
  0xf0   : > { %1129 = vmatpush3.bf16.msra.mxu0 %v1128_v14  ;;  %v925_v14 = vld [vmem:[%s1546_s5] ss:$0 sm:$0xff] }
  0xf1   : > { %1130 = vmatprep.subr.bf16.mxu0 %v1326_v1 }
  0xf4   : > { %1132 = vmatpush3.bf16.msra.mxu0 %v1131_v17 }
  0xf5   : > { %1133 = vmatprep.subr.bf16.mxu0 %v1326_v1 }
  0xf8   : > { %1135 = vmatpush3.bf16.msra.mxu0 %v1134_v20 }
  0xf9   : > { %1136 = vmatprep.subr.bf16.mxu0 %v1326_v1 }
  0xfc   : > { %1138 = vmatpush3.bf16.msra.mxu0 %v1137_v23 }
  0xfd   : > { %1139 = vmatprep.subr.bf16.mxu0 %v1326_v1 }
 0x100   : > { %1141 = vmatpush3.bf16.msra.mxu0 %v1140_v29 }
 0x101   : > { %1029 = vmatprep.subr.mxu0 %v1327_v2 }
 0x1b6   : > { %v379_v31 = vpop.f32.mrb[0].mxu0 }
 0x1b7   : > { %v380_v32 = vadd.f32 %v379_v31, %v308_v30  ;;  %v993_v33 = vpop.f32.mrb[1].mxu0 }
 0x1b9   : > { %496 = vmatmul.mubr.f32.vlgmr.msra.gmra.mrb[0].mxu1 %v380_v32  ;;  %1027 = vmatmul.mubr.f32.vlgmr.msra.gmra.mrb[2].mxu0 %v380_v32 }
 0x1ba   : > { %1031 = vmatprep.mubr.msk.f32.mxu0 %vm1328_vm0, %v1327_v2  ;;  %1071 = vmatprep.mubr.msk.f32.mxu1 %vm1328_vm0, %v1327_v2 }
 0x28c   : > { %v497_v34 = vpop.f32.mrb[0].mxu1  ;;  %v568_v35 = vpop.f32.mrb[2].mxu0 }
 0x28d   : > { %v499_v36 = vpop.f32.mrb[1].mxu1  ;;  %v1028_v37 = vpop.f32.mrb[3].mxu0 }
 0x28e   : > { %1030 = vmatpush3.xpose.msra.mxu0 %v499_v36 }
 0x28f   : > { %1034 = vmatprep.subr.mxu0 %v1327_v2 }
 0x291   : > { %1032 = vmatmul.mubr.f32.vlgmr.msra.gmra.mrb[4].mxu0 %v497_v34 }
 0x292   : > { %1035 = vmatpush3.msra.mxu0 %v568_v35  ;;  %1036 = vmatprep.mubr.msk.f32.mxu0 %vm1328_vm0, %v1327_v2  ;;  %v731_v2 = vld [vmem:[#allocation6] sm:$0xff] }
 0x293   : > { %v1143_v50 = vpack.c.bf16 %v732_v48, %v731_v2 }
 0x295   : > { %1144 = vmatpush3.bf16.msra.mxu1 %v1143_v50 }
 0x296   : > { %1145 = vmatprep.subr.bf16.mxu1 %v1326_v1 }
 0x299   : > { %1147 = vmatpush3.bf16.msra.mxu1 %v1146_v52 }
 0x29a   : > { %1148 = vmatprep.subr.bf16.mxu1 %v1326_v1 }
 0x29d   : > { %1150 = vmatpush3.bf16.msra.mxu1 %v1149_v55 }
 0x29e   : > { %1151 = vmatprep.subr.bf16.mxu1 %v1326_v1 }
 0x2a1   : > { %1153 = vmatpush3.bf16.msra.mxu1 %v1152_v58 }
 0x2a2   : > { %1154 = vmatprep.subr.bf16.mxu1 %v1326_v1 }
 0x2a5   : > { %1156 = vmatpush3.bf16.msra.mxu1 %v1155_v61 }
 0x2a6   : > { %1157 = vmatprep.subr.bf16.mxu1 %v1326_v1 }
 0x2a9   : > { %1159 = vmatpush3.bf16.msra.mxu1 %v1158_v0 }
 0x2aa   : > { %1160 = vmatprep.subr.bf16.mxu1 %v1326_v1 }
 0x2ad   : > { %1162 = vmatpush3.bf16.msra.mxu1 %v1161_v5 }
 0x2ae   : > { %1163 = vmatprep.subr.bf16.mxu1 %v1326_v1 }
 0x2b1   : > { %1165 = vmatpush3.bf16.msra.mxu1 %v1164_v8 }
 0x364   : > { %v638_v39 = vpop.f32.mrb[4].mxu0 }
 0x365   : > { %v645_v40 = vsel %vm644_vm3, %v638_v39, -1e+30  ;;  %v1033_v41 = vpop.f32.mrb[5].mxu0 }
 0x366   : > { %v647_v42 = vsel %vm646_vm4, %v645_v40, -inf }
 0x367   : > { %648 = vmax.xlane.f32.xlu0 %v647_v42 }
 0x3f4   : > { %v649_v43 = vpop.xlane.xlu0 %648 }
 0x3f5   : > { %v650_v44 = vsub.f32 %v645_v40, %v649_v43 }
 0x3f7   : > { %v651_v45 = vmul.f32 1.442695, %v650_v44 }
 0x3f9   : > { %1214 = vpow2.f32 %v651_v45 }
 0x403   : > { %v1215_v46 = vpop.eup %1214 }
 0x404   : > { %v653_v47 = vsel %vm646_vm4, %v1215_v46, 0.0 }
 0x405   : > { %654 = vadd.xlane.f32.xlu1 %v653_v47 }
 0x492   : > { %v655_v9 = vpop.xlane.xlu1 %654 }
 0x493   : > { %1216 = vrcp.f32 %v655_v9 }
 0x49d   : > { %v1217_v10 = vpop.eup %1216 }
 0x49e   : > { %v657_v11 = vmul.f32 %v1217_v10, %v1215_v46 }
 0x4a0   : > { %1037 = vmatmul.mubr.msk.f32.vlgmr.msra.gmra.mrb[6].mxu0 %vm646_vm4, %v657_v11 }
 0x573   : > { %v727_v12 = vpop.f32.mrb[6].mxu0 }
 0x574   : > { %v1038_v13 = vpop.f32.mrb[7].mxu0  ;;  %1072 = vmatmul.mubr.f32.vlgmr.msra.gmra.mrb[2].mxu1 %v727_v12 }
 0x647   : > { %v820_v1 = vpop.f32.mrb[2].mxu1 }
 0x648   : > { %v821_v15 = vadd.f32 %v925_v14, %v820_v1  ;;  %v1073_v16 = vpop.f32.mrb[3].mxu1 }
 0x64a   : > { %824 = vst [vmem:[%s290_s13] sm:$0xff] %v821_v15 }
 0x64b PF: > { %s18_s21 = sadd.s32 1, %s1316_s21  }
 0x64c   : > { %p15_p5 = scmp.ge.s32.totalorder %s18_s21, 4  }
 0x64e   :  { %17 = sbr.rel (!%p15_p5) target bundleno = 2 (0x2), region = 87 }
 0x655   :  { %844 = vsyncpa [#allocation3], 1 }
 0x656   :  { %846 = vsyncpa [#allocation3 + $0x1], 1 }
 0x657   :  { %847 = vsyncpa [#allocation5], 1 }

</bundles_post_ra>
